<compile_context>
chip_gen: v7x
topology: tpu7x:2x2x1
jax: 0.10.0
libtpu: 0.0.40
codegen_flags: <defaults>
</compile_context>

<pallas_src>
import types
import numpy as np

import jax
import jax.numpy as jnp
from jax.experimental import pallas as pl
from jax.experimental.pallas import tpu as pltpu


# ----------------------------------------------------------------------------
# Kernel 1: learned positional encoding (NCHW, tiled over H, no transpose)
# ----------------------------------------------------------------------------
def _pos_encoding_kernel(col_ref, row_ref, out_ref):
    # out block: (F, tH, W).  Grid axis 0 selects the half (0 = col/x-embed
    # channels, 1 = row/y-embed channels); grid axis 1 tiles H.
    c = pl.program_id(0)
    F, tH, W = out_ref.shape

    @pl.when(c == 0)
    def _():
        # x half: out[f, i, j] = col_embed[j, f]; col_ref block is (F, 1, W)
        # -> broadcast of a size-1 sublane dim (no XLU transpose in-kernel).
        out_ref[...] = jnp.broadcast_to(col_ref[...], (F, tH, W))

    @pl.when(c == 1)
    def _():
        # y half: out[f, i, j] = row_embed[h0 + i, f]; row_ref block is
        # (F, tH, 1) -> broadcast of a size-1 lane dim.
        out_ref[...] = jnp.broadcast_to(row_ref[...], (F, tH, W))


def learned_positional_encoding_pallas(col_embed, row_embed, h_tile=None):
    """col_embed: (W, F); row_embed: (H, F).

    Returns the batch-independent positional map of shape (2*F, H, W)
    (NCHW channel layout, col half first, matching
    torch.cat((x_embed, y_embed), -1).permute(2, 0, 1))."""
    W, F = col_embed.shape
    H = row_embed.shape[0]
    if h_tile is None:
        # TODO(synk): at the real 512x512 / num_feats=128 config tune h_tile
        # per chip (~32 on v7x's 64 MiB VMEM, 64-128 on v5e/v6e).
        h_tile = H if H <= 64 else 32
    assert H % h_tile == 0, (H, h_tile)

    # One-time relayouts, hoisted out of the kernel (and, via caching in the
    # head, out of forward() entirely).
    col_b = jnp.transpose(col_embed)[:, None, :]    # (F, 1, W)
    row_b = jnp.transpose(row_embed)[:, :, None]    # (F, H, 1)

    return pl.pallas_call(
        _pos_encoding_kernel,
        out_shape=jax.ShapeDtypeStruct((2 * F, H, W), col_embed.dtype),
        grid_spec=pltpu.PrefetchScalarGridSpec(
            num_scalar_prefetch=0,
            grid=(2, H // h_tile),
            in_specs=[
                pl.BlockSpec((F, 1, W), lambda c, h: (0, 0, 0)),
                pl.BlockSpec((F, h_tile, 1), lambda c, h: (0, h, 0)),
            ],
            # NCHW emitted directly; at the real config (W=512) the output
            # last dim is lane-dense.
            out_specs=pl.BlockSpec((F, h_tile, W), lambda c, h: (c, h, 0)),
        ),
        compiler_params=pltpu.CompilerParams(
            dimension_semantics=("parallel", "parallel"),
            vmem_limit_bytes=64 * 1024 * 1024),
    )(col_b, row_b)


# ----------------------------------------------------------------------------
# Kernel 2: gather unmasked BEV voxel queries (seed queries)
# ----------------------------------------------------------------------------
_GROUP = 256   # output rows gathered per grid step
_CHUNK = 8     # contiguity granularity (one multi-row DMA per contiguous chunk)


def _seed_gather_kernel(idx_ref, cstart_ref, ccontig_ref, q_hbm_ref, out_ref,
                        sem):
    """Gather _GROUP rows of q_hbm straight into out_ref.

    Host-side preprocessing splits the (sorted) gather indices into _CHUNK-row
    chunks; chunks whose indices form a contiguous run are fetched with one
    multi-row DMA, the rest fall back to per-row DMAs.  All DMAs write
    directly into out_ref (no VMEM staging copy) and share one DMA semaphore;
    a single aggregate wait sized to the whole (_GROUP, D) block closes the
    grid step."""
    i = pl.program_id(0)
    chunks_per_group = _GROUP // _CHUNK
    base_chunk = pl.multiple_of(i * chunks_per_group, chunks_per_group)
    base_row = pl.multiple_of(i * _GROUP, _GROUP)

    # Fully unrolled issue loop: back-to-back descriptor pushes keep the
    # scalar + vector-misc slots (the binding resources here) busy.
    for c in range(chunks_per_group):
        out_off = c * _CHUNK
        is_contig = ccontig_ref[base_chunk + c]

        @pl.when(is_contig != 0)
        def _(c=c, out_off=out_off):
            src = cstart_ref[base_chunk + c]
            pltpu.make_async_copy(
                q_hbm_ref.at[pl.ds(src, _CHUNK)],
                out_ref.at[pl.ds(out_off, _CHUNK)],
                sem,
            ).start()

        @pl.when(is_contig == 0)
        def _(c=c, out_off=out_off):
            for g in range(_CHUNK):
                row = idx_ref[base_row + out_off + g]
                pltpu.make_async_copy(
                    q_hbm_ref.at[pl.ds(row, 1)],
                    out_ref.at[pl.ds(out_off + g, 1)],
                    sem,
                ).start()

    # One aggregate wait for the whole group: every start above targets this
    # out block and increments the shared DMA semaphore; the total bytes
    # delivered equal exactly one (_GROUP, D) copy regardless of the
    # contiguous / per-row mix.
    pltpu.make_async_copy(q_hbm_ref.at[pl.ds(0, _GROUP)], out_ref, sem).wait()


def gather_seed_queries_pallas(bev_queries, flat_idx):
    """bev_queries: (N_vox, D) device array (stays in HBM);
    flat_idx: sorted int32 host array of voxel row ids.
    Returns (len(flat_idx), D)."""
    n = int(flat_idx.shape[0])
    N, D = bev_queries.shape
    assert N >= _GROUP, "aggregate-wait descriptor assumes N_vox >= _GROUP"

    n_groups = max(1, -(-n // _GROUP))
    padded = n_groups * _GROUP

    idx_padded = np.empty((padded,), dtype=np.int32)
    idx_padded[:n] = np.asarray(flat_idx, dtype=np.int32)
    if padded > n:
        # Pad with a valid contiguous ramp so padded chunks coalesce into
        # single cheap DMAs; padded rows are sliced off below.
        idx_padded[n:] = np.arange(padded - n, dtype=np.int32) % N

    # Host-side run coalescing at _CHUNK granularity: np.where indices are
    # sorted, so spatially-clustered proposals yield long contiguous runs.
    chunks = idx_padded.reshape(-1, _CHUNK).astype(np.int64)
    chunk_start = chunks[:, 0].astype(np.int32)
    chunk_contig = np.all(
        chunks == chunks[:, :1] + np.arange(_CHUNK, dtype=np.int64)[None, :],
        axis=1).astype(np.int32)

    out = pl.pallas_call(
        _seed_gather_kernel,
        out_shape=jax.ShapeDtypeStruct((padded, D), bev_queries.dtype),
        grid_spec=pltpu.PrefetchScalarGridSpec(
            num_scalar_prefetch=3,
            grid=(n_groups,),
            # Embedding table stays in HBM; rows are DMA-gathered on demand.
            in_specs=[pl.BlockSpec(memory_space=pl.ANY)],
            out_specs=pl.BlockSpec((_GROUP, D), lambda i, idx, cs, cc: (i, 0)),
            scratch_shapes=[pltpu.SemaphoreType.DMA],
        ),
        compiler_params=pltpu.CompilerParams(
            dimension_semantics=("parallel",)),
    )(jnp.asarray(idx_padded), jnp.asarray(chunk_start),
      jnp.asarray(chunk_contig), bev_queries)
    return out[:n]


# ----------------------------------------------------------------------------
# VoxFormerHead (JAX / Pallas)
# ----------------------------------------------------------------------------
class VoxFormerHeadPallas:
    def __init__(self, vox_size, real_size, n_classes, cross_transformer,
                 self_transformer, positional_encoding, embed_dims, key):
        self.bev_h, self.bev_w, self.bev_z = vox_size
        self.real_h, self.real_w = real_size[0], real_size[1]
        self.scene_size = real_size
        self.n_classes = n_classes
        self.embed_dims = embed_dims
        self.num_feats = positional_encoding.num_feats
        self.row_num_embed = positional_encoding.row_num_embed
        self.col_num_embed = positional_encoding.col_num_embed
        self.cross_transformer_cfg = cross_transformer   # stored; encoder TODO(synk)
        self.self_transformer_cfg = self_transformer     # unused in this forward

        n_vox = self.bev_h * self.bev_w * self.bev_z
        k0, k1, k2, k3 = jax.random.split(key, 4)
        # Deterministic synthetic parameters (nn.Embedding weights).
        self.bev_embed = jax.random.normal(k0, (n_vox, embed_dims), jnp.float32)
        self.mask_embed = jax.random.normal(k1, (1, embed_dims), jnp.float32)  # unused here
        self.row_embed = jax.random.uniform(k2, (self.row_num_embed, self.num_feats),
                                            jnp.float32, -1.0, 1.0)
        self.col_embed = jax.random.uniform(k3, (self.col_num_embed, self.num_feats),
                                            jnp.float32, -1.0, 1.0)

        # Per-dtype caches: positional map (static per model) and casted
        # bev_embed table (avoid a per-forward HBM copy of the big table).
        self._pos_cache = {}
        self._bevq_cache = {}
        # Hoist the positional-encoding pallas_call out of forward().
        self._get_pos_map(jnp.float32, self.row_num_embed, self.col_num_embed)

    # -- cached helpers -------------------------------------------------------
    def _get_pos_map(self, dtype, h, w):
        key = (jnp.dtype(dtype).name, h, w)
        if key not in self._pos_cache:
            self._pos_cache[key] = learned_positional_encoding_pallas(
                self.col_embed[:w].astype(dtype),
                self.row_embed[:h].astype(dtype))
        return self._pos_cache[key]

    def _get_bev_queries(self, dtype):
        key = jnp.dtype(dtype).name
        if key not in self._bevq_cache:
            self._bevq_cache[key] = self.bev_embed.astype(dtype)
        return self._bevq_cache[key]

    # -- reference-identical numpy bookkeeping --------------------------------
    def get_ref_3d(self, vox_origin):
        voxel_size = self.real_h / self.bev_h
        vol_bnds = np.zeros((3, 2))
        vol_bnds[:, 0] = vox_origin
        vol_bnds[:, 1] = vox_origin + np.array(self.scene_size)
        vol_dim = np.ceil((vol_bnds[:, 1] - vol_bnds[:, 0]) / voxel_size
                          ).copy(order='C').astype(int)
        idx = np.array([range(vol_dim[0] * vol_dim[1] * vol_dim[2])])
        xv, yv, zv = np.meshgrid(range(vol_dim[0]), range(vol_dim[1]),
                                 range(vol_dim[2]), indexing='ij')
        vox_coords = np.concatenate(
            [xv.reshape(1, -1), yv.reshape(1, -1), zv.reshape(1, -1), idx],
            axis=0).astype(int).T
        ref_3d = np.concatenate(
            [(xv.reshape(1, -1) + 0.5) / self.bev_h,
             (yv.reshape(1, -1) + 0.5) / self.bev_w,
             (zv.reshape(1, -1) + 0.5) / self.bev_z],
            axis=0).astype(np.float64).T
        return vox_coords, ref_3d

    # -- forward ---------------------------------------------------------------
    def forward(self, mlvl_feats, proposal, lidar2img, vox_origin, pc_range):
        bs, num_cam = mlvl_feats[0].shape[:2]
        dtype = mlvl_feats[0].dtype

        bev_queries = self._get_bev_queries(dtype)

        # NOTE: the original module hard-codes a 512x512 zero mask; here the
        # mask spatial size equals (row_num_embed, col_num_embed) to keep the
        # demo small.
        # TODO(synk): use h = w = 512 (and >=512-entry tables) for shape parity
        # with the reference module.
        h, w = self.row_num_embed, self.col_num_embed
        pos = self._get_pos_map(dtype, h, w)               # (2F, H, W), cached
        # Batch copies only materialized here because the (stubbed) consumer
        # transformer is not implemented; at real size keep the (1,...) map.
        bev_pos_cross_attn = jnp.broadcast_to(
            pos[None], (bs, 2 * self.num_feats, h, w))

        proposal_np = np.asarray(proposal).reshape(
            bs, self.bev_h, self.bev_w, self.bev_z)[0]
        unmasked_idx = np.asarray(np.where(proposal_np.reshape(-1) > 0)).astype(np.int32)
        masked_idx = np.asarray(np.where(proposal_np.reshape(-1) == 0)).astype(np.int32)  # noqa: F841

        vox_coords, ref_3d = self.get_ref_3d(vox_origin)

        flat_idx = vox_coords[unmasked_idx[0], 3].astype(np.int32)
        seed_queries = gather_seed_queries_pallas(bev_queries, flat_idx)

        # TODO(synk): PerceptionTransformer.get_vox_features (deformable
        # cross-attention encoder) is not defined in the reference module; the
        # gathered unmasked seed queries are returned in its place.
        seed_feats = seed_queries[None]          # (bs, n_unmasked, embed_dims)
        return {"seed_feats": seed_feats,
                "bev_pos_cross_attn": bev_pos_cross_attn}


# ----------------------------------------------------------------------------
if __name__ == "__main__":
    key = jax.random.PRNGKey(0)
    k_param, k_feat, k_prop, k_l2i = jax.random.split(key, 4)

    # Small, module-consistent shapes.
    vox_size = (8, 8, 4)                    # bev_h, bev_w, bev_z -> 256 voxels
    real_size = (3.2, 3.2, 1.6)             # real_h/bev_h = 0.4 voxel size
    embed_dims = 32
    n_classes = 2
    bs, num_cam, C, Hf, Wf = 1, 2, embed_dims, 8, 16

    positional_encoding = types.SimpleNamespace(
        num_feats=embed_dims // 2, row_num_embed=16, col_num_embed=16)
    cross_transformer = types.SimpleNamespace(
        num_cams=num_cam, encoder=None, embed_dims=embed_dims,
        rotate_prev_bev=False, use_shift=False)
    self_transformer = None

    head = VoxFormerHeadPallas(vox_size, real_size, n_classes,
                               cross_transformer, self_transformer,
                               positional_encoding, embed_dims, k_param)

    mlvl_feats = [jax.random.normal(k_feat, (bs, num_cam, C, Hf, Wf), jnp.float32)]
    n_vox = vox_size[0] * vox_size[1] * vox_size[2]
    proposal = jax.random.bernoulli(k_prop, 0.5, (bs, n_vox)).astype(jnp.float32)
    proposal = proposal.at[0, 0].set(1.0)    # guarantee >= 1 unmasked voxel
    lidar2img = jax.random.normal(k_l2i, (bs, num_cam, 4, 4), jnp.float32)
    vox_origin = np.array([0.0, 0.0, 0.0])
    pc_range = [0.0, 0.0, 0.0, real_size[0], real_size[1], real_size[2]]

    out = head.forward(mlvl_feats, proposal, lidar2img, vox_origin, pc_range)
    jax.block_until_ready(out)

    # Shape checks.
    assert out["bev_pos_cross_attn"].shape == (
        bs, 2 * positional_encoding.num_feats,
        positional_encoding.row_num_embed, positional_encoding.col_num_embed)
    assert out["seed_feats"].shape[0] == bs
    assert out["seed_feats"].shape[2] == embed_dims

    # Numerical check of the positional encoding against the torch recipe.
    col = np.asarray(head.col_embed)          # (W, F)
    row = np.asarray(head.row_embed)          # (H, F)
    H_, W_ = positional_encoding.row_num_embed, positional_encoding.col_num_embed
    F_ = positional_encoding.num_feats
    ref_pos = np.concatenate(
        [np.broadcast_to(col[None, :, :], (H_, W_, F_)),
         np.broadcast_to(row[:, None, :], (H_, W_, F_))], axis=-1
    ).transpose(2, 0, 1)[None].repeat(bs, axis=0)
    np.testing.assert_allclose(np.asarray(out["bev_pos_cross_attn"]), ref_pos,
                               rtol=1e-6, atol=1e-6)

    # Numerical check of the seed-query gather.
    proposal_np = np.asarray(proposal).reshape(bs, *vox_size)[0]
    unmasked = np.where(proposal_np.reshape(-1) > 0)[0]
    vox_coords, _ = head.get_ref_3d(vox_origin)
    ref_seed = np.asarray(head.bev_embed)[vox_coords[unmasked, 3]]
    np.testing.assert_allclose(np.asarray(out["seed_feats"][0]), ref_seed,
                               rtol=1e-6, atol=1e-6)

    print("KERNEL_OK")
</pallas_src>

<mosaic_0001>
module attributes {stable_mosaic.version = 11 : i64} {
  func.func @_pos_encoding_kernel(%arg0: i32, %arg1: i32, %arg2: memref<16x1x16xf32, #tpu.memory_space<vmem>>, %arg3: memref<16x16x1xf32, #tpu.memory_space<vmem>>, %arg4: memref<16x16x16xf32, #tpu.memory_space<vmem>>) attributes {dimension_semantics = [#tpu.dimension_semantics<parallel>, #tpu.dimension_semantics<parallel>], iteration_bounds = array<i64: 2, 1>, scalar_prefetch = 0 : i64, scratch_operands = 0 : i64, tpu.core_type = #tpu.core_type<tc>, window_params = [{pipeline_mode = #tpu.pipeline_mode<synchronous>, transform_indices = @transform_0, window_bounds = array<i64: 16, 1, 16>}, {transform_indices = @transform_1, window_bounds = array<i64: 16, 16, 1>}, {transform_indices = @transform_2, window_bounds = array<i64: 16, 16, 16>}]} {
    %c0_i32 = arith.constant 0 : i32
    %0 = arith.cmpi eq, %arg0, %c0_i32 : i32
    %1 = arith.extui %0 : i1 to i32
    %c0_i32_0 = arith.constant 0 : i32
    %2 = arith.cmpi ne, %1, %c0_i32_0 : i32
    scf.if %2 {
      %c0 = arith.constant 0 : index
      %c0_2 = arith.constant 0 : index
      %c0_3 = arith.constant 0 : index
      %6 = vector.load %arg2[%c0, %c0_2, %c0_3] : memref<16x1x16xf32, #tpu.memory_space<vmem>>, vector<16x1x16xf32>
      %7 = vector.shape_cast %6 : vector<16x1x16xf32> to vector<16x1x16xf32>
      %8 = vector.broadcast %7 : vector<16x1x16xf32> to vector<16x16x16xf32>
      %c0_4 = arith.constant 0 : index
      %c0_5 = arith.constant 0 : index
      %c0_6 = arith.constant 0 : index
      %9 = vector.load %arg4[%c0_4, %c0_5, %c0_6] : memref<16x16x16xf32, #tpu.memory_space<vmem>>, vector<16x16x16xf32>
      tpu.vector_store %arg4[%c0_4, %c0_5, %c0_6], %8 {strides = array<i32>} : memref<16x16x16xf32, #tpu.memory_space<vmem>>, vector<16x16x16xf32>,
    } else {
    }
    %c1_i32 = arith.constant 1 : i32
    %3 = arith.cmpi eq, %arg0, %c1_i32 : i32
    %4 = arith.extui %3 : i1 to i32
    %c0_i32_1 = arith.constant 0 : i32
    %5 = arith.cmpi ne, %4, %c0_i32_1 : i32
    scf.if %5 {
      %c0 = arith.constant 0 : index
      %c0_2 = arith.constant 0 : index
      %c0_3 = arith.constant 0 : index
      %6 = vector.load %arg3[%c0, %c0_2, %c0_3] : memref<16x16x1xf32, #tpu.memory_space<vmem>>, vector<16x16x1xf32>
      %7 = vector.shape_cast %6 : vector<16x16x1xf32> to vector<16x16x1xf32>
      %8 = vector.broadcast %7 : vector<16x16x1xf32> to vector<16x16x16xf32>
      %c0_4 = arith.constant 0 : index
      %c0_5 = arith.constant 0 : index
      %c0_6 = arith.constant 0 : index
      %9 = vector.load %arg4[%c0_4, %c0_5, %c0_6] : memref<16x16x16xf32, #tpu.memory_space<vmem>>, vector<16x16x16xf32>
      tpu.vector_store %arg4[%c0_4, %c0_5, %c0_6], %8 {strides = array<i32>} : memref<16x16x16xf32, #tpu.memory_space<vmem>>, vector<16x16x16xf32>,
    } else {
    }
    return
  }
  func.func @transform_0(%arg0: i32, %arg1: i32) -> (i32, i32, i32) {
    %c0_i32 = arith.constant 0 : i32
    %c0_i32_0 = arith.constant 0 : i32
    %c0_i32_1 = arith.constant 0 : i32
    %c0_i32_2 = arith.constant 0 : i32
    return %c0_i32, %c0_i32_0, %c0_i32_1 : i32, i32, i32
  }
  func.func @transform_1(%arg0: i32, %arg1: i32) -> (i32, i32, i32) {
    %c0_i32 = arith.constant 0 : i32
    %c0_i32_0 = arith.constant 0 : i32
    %c0_i32_1 = arith.constant 0 : i32
    return %c0_i32, %arg1, %c0_i32_0 : i32, i32, i32
  }
  func.func @transform_2(%arg0: i32, %arg1: i32) -> (i32, i32, i32) {
    %c0_i32 = arith.constant 0 : i32
    %c0_i32_0 = arith.constant 0 : i32
    return %arg0, %arg1, %c0_i32 : i32, i32, i32
  }
}

</mosaic_0001>

<bundles_post_ra>
// kernel: tpu_custom_call.1
= control target key start
LH: loop header
LB: loop body
LE: loop exit
PB: predicated region body
PF: predicated region fallthrough
CT: control target
= control target key end

     0   :  { %7 = vsyncpa [#allocation3], 0  ;;  %s1268_s0 = inlined_call_operand.hbm [shape: f32[16,1,16], index: 0, kind: input, shape index: {}]   ;;  %s1269_s1 = inlined_call_operand.hbm [shape: f32[16,16,1], index: 1, kind: input, shape index: {}]   ;;  %s1270_s2 = inlined_call_operand.hbm [shape: f32[32,16,16], index: 2, kind: output, shape index: {}]  }
   0x1   :  { %8 = vsyncpa [#allocation6], 0 }
   0x2   :  { %9 = vsyncpa [#allocation4], 0 }
   0x3   :  { %11 = vsyncpa [#allocation4 + $0x1], 0  ;;  %s946_s9 = smov 0   ;;  %s948_s10 = smov 0  }
   0x4   :  { %s950_s11 = smov 0   ;;  %s952_s12 = smov 0  }
   0x5   :  { %s954_s13 = smov 0   ;;  %s956_s14 = smov 0  }
   0x6 LB: > { %s657_s15 = sadd.s32 4294967295, %s919_s14   ;;  %s658_s16 = sadd.s32 4294967294, %s919_s14   ;;  %s919_s14 = sphi %s956_s14, %s17_s14   ;;  %s915_s13 = sphi %s954_s13, %s1288_s13   ;;  %s911_s12 = sphi %s952_s12, %s1287_s12   ;;  %s907_s11 = sphi %s950_s11, %s1286_s11   ;;  %s903_s10 = sphi %s948_s10, %s1285_s10   ;;  %s899_s9 = sphi %s946_s9, %s1284_s9  }
   0x7   : > { %s29_s17 = sadd.s32 1, %s915_s13  ;;  %s85_s18 = sadd.s32 1, %s907_s11 }
   0x8   : > { %p31_p0 = scmp.ge.s32.totalorder %s29_s17, 2  ;;  %p95_p1 = scmp.ne.s32.totalorder %s907_s11, %s903_s10 }
   0x9   : > { %p96_p2 = scmp.eq.s32.totalorder %s657_s15, 1  ;;  %p101_p3 = scmp.ne.s32.totalorder %s903_s10, %s899_s9 }
   0xa   : > { %s1290_s17 = smov (%p31_p0, %s29_s17), 0  ;;  %p102_p5 = scmp.eq.s32.totalorder %s658_s16, 1 }
   0xb   : > { %p986_p4 = por %p96_p2, %p95_p1  ;;  %s80_s20 = ssub.s32 %s915_s13, %s1290_s17 }
   0xc   : > { %p659_p6 = scmp.ge.s32.totalorder %s919_s14, 1  ;;  %p83_p7 = scmp.eq.s32.totalorder %s80_s20, 0 }
   0xd   : > { %s1275_s19 = scalar_select %p986_p4, 1, 0 }
   0xe   : > { %p993_p8 = por %p102_p5, %p101_p3  ;;  %p109_p9 = scmp.lt.s32.totalorder %s919_s14, 3 }
   0xf   : > { %s999_s22 = scalar_select %p83_p7, %s907_s11, %s85_s18  }
  0x10   : > { %s1276_s21 = scalar_select %p993_p8, 1, 0 }
  0x11   : > { %p1001_p10 = pnand %p659_p6, %p109_p9  ;;  %p1005_p11 = scmp.eq.s32.totalorder %s657_s15, 0 }
  0x12   : > { %s921_s25 = smov [#allocation2]   ;;  %s922_s28 = smov [#allocation5]  }
  0x13   : > { %s1277_s23 = scalar_select %p1001_p10, 1, 0 }
  0x14   : > { %s1278_s24 = scalar_select %p1005_p11, 1, 0 }
  0x15   : > { %p702_p12 = pneg %p1001_p10  ;;  %s121_s26 = sshll.u32 %s921_s25, 4  ;;  %s122_s26 = int_to_ptr.vmem [resolvable:$true] %s121_s26 }
  0x16   : > { %s137_s29 = sshll.u32 %s922_s28, 4  ;;  %s777_s4 = scalar_lea.hbm %s1268_s0, 256  ;;  %s1017_s29 = int_to_ptr.vmem [resolvable:$true] %s137_s29 }
  0x17   : > { %p1013_p13 = pnand %p1005_p11, %p702_p12  ;;  %p778_p0 = scmp.ne.s32.totalorder %s1268_s0, %s777_s4 }
  0x18   : > { %p784_p5 = scmp.lt.u32.totalorder %s777_s4, %s1268_s0 }
  0x19   : > { %p779_p1 = pneg %p1013_p13 }
  0x1b   : > { %p780_p2 = pnand %p779_p1, %p778_p0 }
  0x1d   : > { %p781_p3 = pneg %p780_p2 }
  0x1f   : > { %p786_p6 = pnand %p784_p5, %p781_p3 }
  0x21   : > { %789 = shalt.err (!%p786_p6)
}
  0x22   : > { %s790_s15 = scalar_lea.vmem %s122_s26, 256  ;;  %p798_p8 = scmp.lt.s32.totalorder %s122_s26, %s122_s26 }
  0x23   : > { %p791_p7 = scmp.ne.s32.totalorder %s122_s26, %s790_s15  ;;  %p799_p4 = scmp.lt.s32.totalorder %s790_s15, %s790_s15 }
  0x25   : > { %p793_p9 = pnand %p791_p7, %p779_p1  ;;  %p800_p11 = por %p799_p4, %p798_p8 }
  0x27   : > { %p794_p12 = pneg %p793_p9 }
  0x29   : > { %p801_p10 = pnand %p800_p11, %p794_p12 }
  0x2b   : > { %804 = shalt.err (!%p801_p10)
}
  0x2c   : > { %s923_s16 = smov 16   ;;  %s924_s18 = smov 1  }
  0x2d   : > { %705 = dma.hbm_to_vmem [thread:$0]  (!%p1013_p13), %s1268_s0, 256, %s122_s26, [#allocation3], %s923_s16, %s923_s16, %s924_s18  }
  0x2e   : > { %s805_s3 = scalar_lea.hbm %s1269_s1, 4096 }
  0x2f   : > { %p806_p0 = scmp.ne.s32.totalorder %s1269_s1, %s805_s3  ;;  %p812_p10 = scmp.lt.u32.totalorder %s805_s3, %s1269_s1 }
  0x31   : > { %p808_p4 = pnand %p806_p0, %p779_p1 }
  0x33   : > { %p809_p8 = pneg %p808_p4 }
  0x35   : > { %p814_p11 = pnand %p812_p10, %p809_p8 }
  0x37   : > { %817 = shalt.err (!%p814_p11)
}
  0x38   : > { %s818_s26 = scalar_lea.vmem %s1017_s29, 4096  ;;  %p826_p6 = scmp.lt.s32.totalorder %s1017_s29, %s1017_s29 }
  0x39   : > { %p819_p2 = scmp.ne.s32.totalorder %s1017_s29, %s818_s26  ;;  %p827_p7 = scmp.lt.s32.totalorder %s818_s26, %s818_s26 }
  0x3b   : > { %p821_p3 = pnand %p819_p2, %p779_p1  ;;  %p828_p9 = por %p827_p7, %p826_p6 }
  0x3d   : > { %p822_p5 = pneg %p821_p3 }
  0x3f   : > { %p829_p12 = pnand %p828_p9, %p822_p5 }
  0x41   : > { %832 = shalt.err (!%p829_p12)
}
  0x42   : > { %s925_s8 = smov 128   ;;  %s926_s15 = smov 8  }
  0x43   : > { %708 = dma.hbm_to_vmem [thread:$0]  (!%p1013_p13), %s1269_s1, 4096, %s1017_s29, [#allocation6], %s925_s8, %s925_s8, %s926_s15  }
  0x44   : > { %p1280_p0 = scmp.ne.s32.totalorder %s1277_s23, 0 }
  0x45   : > { %p1281_p1 = scmp.ne.s32.totalorder (!%p1280_p0), %s1278_s24, 0 }
  0x46   : > { %153 = sbr.rel (%p1280_p0) target bundleno = 317 (0x13d), region = 28 }
  0x4d   : > { %886 = dma.done.wait (%p1281_p1), [#allocation3], 256  }
  0x4e   : > { %888 = vsyncadd (%p1281_p1), [#allocation3], 4294967040 }
  0x4f   : > { %890 = dma.done.wait (%p1281_p1), [#allocation6], 4096  }
  0x50   : > { %892 = vsyncadd (%p1281_p1), [#allocation6], 4294963200  ;;  %s171_s27 = sand.u32 1, %s903_s10   ;;  %p666_p13 = scmp.ne.s32.totalorder %s911_s12, 0 }
  0x51   : > { %s665_s29 = sshll.u32 %s171_s27, 8  ;;  %v667_v0 = vld [vmem:[#allocation2] ss:$0 sm:$0xff] (!%p666_p13)  ;;  %vm293_vm0 = vcmask (!%p666_p13), 130048   ;;  %v668_v1 = vld [vmem:[#allocation2 + $0x1] ss:$0 sm:$0xff] (!%p666_p13) }
  0x52   : > { %s1079_s20 = scalar_lea.vmem [#allocation7], %s665_s29  ;;  %180 = sbr.rel (%p666_p13) target bundleno = 99 (0x63), region = 40  ;;  %v669_v2 = vld [vmem:[#allocation2 + $0x2] ss:$0 sm:$0xff] (!%p666_p13)  ;;  %v670_v3 = vld [vmem:[#allocation2 + $0x3] ss:$0 sm:$0xff] (!%p666_p13) }
  0x53   : > { %294 = vst.msk [vmem:[%s1079_s20] sm:$0xff] (!%p666_p13), %vm293_vm0, %v667_v0  ;;  %295 = vst.msk [vmem:[%s1079_s20 + $0x8] sm:$0xff] (!%p666_p13), %vm293_vm0, %v667_v0  ;;  %v671_v4 = vld [vmem:[#allocation2 + $0x4] ss:$0 sm:$0xff] (!%p666_p13)  ;;  %v672_v5 = vld [vmem:[#allocation2 + $0x5] ss:$0 sm:$0xff] (!%p666_p13) }
  0x54   : > { %296 = vst.msk [vmem:[%s1079_s20 + $0x10] sm:$0xff] (!%p666_p13), %vm293_vm0, %v668_v1  ;;  %297 = vst.msk [vmem:[%s1079_s20 + $0x18] sm:$0xff] (!%p666_p13), %vm293_vm0, %v668_v1  ;;  %v673_v6 = vld [vmem:[#allocation2 + $0x6] ss:$0 sm:$0xff] (!%p666_p13)  ;;  %v674_v7 = vld [vmem:[#allocation2 + $0x7] ss:$0 sm:$0xff] (!%p666_p13) }
  0x55   : > { %298 = vst.msk [vmem:[%s1079_s20 + $0x20] sm:$0xff] (!%p666_p13), %vm293_vm0, %v669_v2  ;;  %299 = vst.msk [vmem:[%s1079_s20 + $0x28] sm:$0xff] (!%p666_p13), %vm293_vm0, %v669_v2  ;;  %v675_v8 = vld [vmem:[#allocation2 + $0x8] ss:$0 sm:$0xff] (!%p666_p13)  ;;  %v676_v9 = vld [vmem:[#allocation2 + $0x9] ss:$0 sm:$0xff] (!%p666_p13) }
  0x56   : > { %300 = vst.msk [vmem:[%s1079_s20 + $0x30] sm:$0xff] (!%p666_p13), %vm293_vm0, %v670_v3  ;;  %301 = vst.msk [vmem:[%s1079_s20 + $0x38] sm:$0xff] (!%p666_p13), %vm293_vm0, %v670_v3  ;;  %v677_v10 = vld [vmem:[#allocation2 + $0xa] ss:$0 sm:$0xff] (!%p666_p13)  ;;  %v678_v11 = vld [vmem:[#allocation2 + $0xb] ss:$0 sm:$0xff] (!%p666_p13) }
  0x57   : > { %302 = vst.msk [vmem:[%s1079_s20 + $0x40] sm:$0xff] (!%p666_p13), %vm293_vm0, %v671_v4  ;;  %303 = vst.msk [vmem:[%s1079_s20 + $0x48] sm:$0xff] (!%p666_p13), %vm293_vm0, %v671_v4  ;;  %v679_v12 = vld [vmem:[#allocation2 + $0xc] ss:$0 sm:$0xff] (!%p666_p13)  ;;  %v680_v13 = vld [vmem:[#allocation2 + $0xd] ss:$0 sm:$0xff] (!%p666_p13) }
  0x58   : > { %304 = vst.msk [vmem:[%s1079_s20 + $0x50] sm:$0xff] (!%p666_p13), %vm293_vm0, %v672_v5  ;;  %305 = vst.msk [vmem:[%s1079_s20 + $0x58] sm:$0xff] (!%p666_p13), %vm293_vm0, %v672_v5  ;;  %v681_v14 = vld [vmem:[#allocation2 + $0xe] ss:$0 sm:$0xff] (!%p666_p13)  ;;  %v682_v15 = vld [vmem:[#allocation2 + $0xf] ss:$0 sm:$0xff] (!%p666_p13) }
  0x59   : > { %306 = vst.msk [vmem:[%s1079_s20 + $0x60] sm:$0xff] %vm293_vm0, %v673_v6  ;;  %307 = vst.msk [vmem:[%s1079_s20 + $0x68] sm:$0xff] %vm293_vm0, %v673_v6 }
  0x5a   : > { %308 = vst.msk [vmem:[%s1079_s20 + $0x70] sm:$0xff] %vm293_vm0, %v674_v7  ;;  %309 = vst.msk [vmem:[%s1079_s20 + $0x78] sm:$0xff] %vm293_vm0, %v674_v7 }
  0x5b   : > { %310 = vst.msk [vmem:[%s1079_s20 + $0x80] sm:$0xff] %vm293_vm0, %v675_v8  ;;  %311 = vst.msk [vmem:[%s1079_s20 + $0x88] sm:$0xff] %vm293_vm0, %v675_v8 }
  0x5c   : > { %312 = vst.msk [vmem:[%s1079_s20 + $0x90] sm:$0xff] %vm293_vm0, %v676_v9  ;;  %313 = vst.msk [vmem:[%s1079_s20 + $0x98] sm:$0xff] %vm293_vm0, %v676_v9 }
  0x5d   : > { %314 = vst.msk [vmem:[%s1079_s20 + $0xa0] sm:$0xff] %vm293_vm0, %v677_v10  ;;  %315 = vst.msk [vmem:[%s1079_s20 + $0xa8] sm:$0xff] %vm293_vm0, %v677_v10 }
  0x5e   : > { %316 = vst.msk [vmem:[%s1079_s20 + $0xb0] sm:$0xff] %vm293_vm0, %v678_v11  ;;  %317 = vst.msk [vmem:[%s1079_s20 + $0xb8] sm:$0xff] %vm293_vm0, %v678_v11 }
  0x5f   : > { %318 = vst.msk [vmem:[%s1079_s20 + $0xc0] sm:$0xff] %vm293_vm0, %v679_v12  ;;  %319 = vst.msk [vmem:[%s1079_s20 + $0xc8] sm:$0xff] %vm293_vm0, %v679_v12 }
  0x60   : > { %320 = vst.msk [vmem:[%s1079_s20 + $0xd0] sm:$0xff] %vm293_vm0, %v680_v13  ;;  %321 = vst.msk [vmem:[%s1079_s20 + $0xd8] sm:$0xff] %vm293_vm0, %v680_v13 }
  0x61   : > { %322 = vst.msk [vmem:[%s1079_s20 + $0xe0] sm:$0xff] %vm293_vm0, %v681_v14  ;;  %323 = vst.msk [vmem:[%s1079_s20 + $0xe8] sm:$0xff] %vm293_vm0, %v681_v14 }
  0x62   : > { %324 = vst.msk [vmem:[%s1079_s20 + $0xf0] sm:$0xff] %vm293_vm0, %v682_v15  ;;  %325 = vst.msk [vmem:[%s1079_s20 + $0xf8] sm:$0xff] %vm293_vm0, %v682_v15 }
  0x63 PF: > { %p683_p4 = scmp.ne.s32.totalorder %s911_s12, 1 }
  0x64   : > { %v332_v16 = vld [vmem:[#allocation5 + $0x10] sm:$0xff] (!%p683_p4)  ;;  %v330_v17 = vld [vmem:[#allocation5] sm:$0xff] (!%p683_p4)  ;;  %v927_v18 = vmov (!%p683_p4), 0   ;;  %v333_v19 = vld [vmem:[#allocation5 + $0x18] sm:$0xff] (!%p683_p4)  ;;  %vm522_vm1 = vcmask (!%p683_p4), 130048  }
  0x65   : > { %329 = sbr.rel (%p683_p4) target bundleno = 291 (0x123), region = 44  ;;  %776 = vset.pattern.permute.xlu1 (!%p683_p4), %v927_v18  ;;  %775 = vset.pattern.permute.xlu0 (!%p683_p4), %v927_v18  ;;  %v331_v20 = vld [vmem:[#allocation5 + $0x8] sm:$0xff] (!%p683_p4)  ;;  %v334_v22 = vld [vmem:[#allocation5 + $0x20] sm:$0xff] (!%p683_p4)  ;;  %v337_v23 = vld [vmem:[#allocation5 + $0x38] sm:$0xff] (!%p683_p4) }
  0x66   : > { %374 = vperm.xlu1 (!%p683_p4), %776, %v332_v16   ;;  %364 = vperm.xlu0 (!%p683_p4), %775, %v330_v17   ;;  %v335_v21 = vld [vmem:[#allocation5 + $0x28] sm:$0xff] (!%p683_p4)  ;;  %v336_v24 = vld [vmem:[#allocation5 + $0x30] sm:$0xff] (!%p683_p4)  ;;  %v338_v26 = vld [vmem:[#allocation5 + $0x40] sm:$0xff] (!%p683_p4) }
  0x67   : > { %v339_v25 = vld [vmem:[#allocation5 + $0x48] sm:$0xff] (!%p683_p4)  ;;  %v341_v27 = vld [vmem:[#allocation5 + $0x58] sm:$0xff] (!%p683_p4)  ;;  %v340_v28 = vld [vmem:[#allocation5 + $0x50] sm:$0xff] (!%p683_p4) }
  0x68   : > { %v343_v29 = vld [vmem:[#allocation5 + $0x68] sm:$0xff] (!%p683_p4)  ;;  %v342_v30 = vld [vmem:[#allocation5 + $0x60] sm:$0xff] (!%p683_p4)  ;;  %v345_v31 = vld [vmem:[#allocation5 + $0x78] sm:$0xff] (!%p683_p4) }
  0x69   : > { %v344_v32 = vld [vmem:[#allocation5 + $0x70] sm:$0xff] (!%p683_p4)  ;;  %v347_v33 = vld [vmem:[#allocation5 + $0x88] sm:$0xff] (!%p683_p4)  ;;  %v346_v34 = vld [vmem:[#allocation5 + $0x80] sm:$0xff] (!%p683_p4) }
  0x6a   : > { %379 = vperm.xlu1 (!%p683_p4), %776, %v333_v19   ;;  %369 = vperm.xlu0 (!%p683_p4), %775, %v331_v20   ;;  %v349_v35 = vld [vmem:[#allocation5 + $0x98] sm:$0xff] (!%p683_p4)  ;;  %v348_v36 = vld [vmem:[#allocation5 + $0x90] sm:$0xff] (!%p683_p4)  ;;  %v351_v37 = vld [vmem:[#allocation5 + $0xa8] sm:$0xff] (!%p683_p4) }
  0x6b   : > { %v350_v38 = vld [vmem:[#allocation5 + $0xa0] sm:$0xff] (!%p683_p4)  ;;  %v353_v39 = vld [vmem:[#allocation5 + $0xb8] sm:$0xff] (!%p683_p4)  ;;  %v352_v40 = vld [vmem:[#allocation5 + $0xb0] sm:$0xff] (!%p683_p4) }
  0x6c   : > { %v355_v41 = vld [vmem:[#allocation5 + $0xc8] sm:$0xff]  ;;  %v354_v42 = vld [vmem:[#allocation5 + $0xc0] sm:$0xff]  ;;  %v357_v43 = vld [vmem:[#allocation5 + $0xd8] sm:$0xff] }
  0x6d   : > { %v356_v44 = vld [vmem:[#allocation5 + $0xd0] sm:$0xff]  ;;  %v359_v45 = vld [vmem:[#allocation5 + $0xe8] sm:$0xff]  ;;  %v358_v46 = vld [vmem:[#allocation5 + $0xe0] sm:$0xff] }
  0x6e   : > { %389 = vperm.xlu1 %776, %v335_v21   ;;  %384 = vperm.xlu0 %775, %v334_v22   ;;  %v361_v47 = vld [vmem:[#allocation5 + $0xf8] sm:$0xff]  ;;  %v360_v48 = vld [vmem:[#allocation5 + $0xf0] sm:$0xff] }
  0x72   : > { %399 = vperm.xlu1 %776, %v337_v23   ;;  %394 = vperm.xlu0 %775, %v336_v24  }
  0x76   : > { %409 = vperm.xlu1 %776, %v339_v25   ;;  %404 = vperm.xlu0 %775, %v338_v26  }
  0x7a   : > { %419 = vperm.xlu1 %776, %v341_v27   ;;  %414 = vperm.xlu0 %775, %v340_v28  }
  0x7e   : > { %429 = vperm.xlu1 %776, %v343_v29   ;;  %424 = vperm.xlu0 %775, %v342_v30  }
  0x82   : > { %439 = vperm.xlu1 %776, %v345_v31   ;;  %434 = vperm.xlu0 %775, %v344_v32  }
  0x86   : > { %449 = vperm.xlu1 %776, %v347_v33   ;;  %444 = vperm.xlu0 %775, %v346_v34  }
  0x8a   : > { %459 = vperm.xlu1 %776, %v349_v35   ;;  %454 = vperm.xlu0 %775, %v348_v36  }
  0x8e   : > { %469 = vperm.xlu1 %776, %v351_v37   ;;  %464 = vperm.xlu0 %775, %v350_v38  }
  0x92   : > { %479 = vperm.xlu1 %776, %v353_v39   ;;  %474 = vperm.xlu0 %775, %v352_v40  }
  0x96   : > { %489 = vperm.xlu1 %776, %v355_v41   ;;  %484 = vperm.xlu0 %775, %v354_v42  }
  0x9a   : > { %499 = vperm.xlu1 %776, %v357_v43   ;;  %494 = vperm.xlu0 %775, %v356_v44  }
  0x9e   : > { %509 = vperm.xlu1 %776, %v359_v45   ;;  %504 = vperm.xlu0 %775, %v358_v46  }
  0xa2   : > { %519 = vperm.xlu1 %776, %v361_v47   ;;  %514 = vperm.xlu0 %775, %v360_v48  }
  0xe5   : > { %v375_v49 = vpop.permute.xlu1 %374  ;;  %v365_v50 = vpop.permute.xlu0 %364 }
  0xe6   : > { %525 = vst.msk [vmem:[%s1079_s20 + $0x10] sm:$0xff] %vm522_vm1, %v375_v49  ;;  %523 = vst.msk [vmem:[%s1079_s20] sm:$0xff] %vm522_vm1, %v365_v50 }
  0xe9   : > { %v380_v51 = vpop.permute.xlu1 %379  ;;  %v370_v52 = vpop.permute.xlu0 %369 }
  0xea   : > { %526 = vst.msk [vmem:[%s1079_s20 + $0x18] sm:$0xff] %vm522_vm1, %v380_v51  ;;  %524 = vst.msk [vmem:[%s1079_s20 + $0x8] sm:$0xff] %vm522_vm1, %v370_v52 }
  0xed   : > { %v390_v53 = vpop.permute.xlu1 %389  ;;  %v385_v54 = vpop.permute.xlu0 %384 }
  0xee   : > { %528 = vst.msk [vmem:[%s1079_s20 + $0x28] sm:$0xff] %vm522_vm1, %v390_v53  ;;  %527 = vst.msk [vmem:[%s1079_s20 + $0x20] sm:$0xff] %vm522_vm1, %v385_v54 }
  0xf1   : > { %v400_v55 = vpop.permute.xlu1 %399  ;;  %v395_v56 = vpop.permute.xlu0 %394 }
  0xf2   : > { %530 = vst.msk [vmem:[%s1079_s20 + $0x38] sm:$0xff] %vm522_vm1, %v400_v55  ;;  %529 = vst.msk [vmem:[%s1079_s20 + $0x30] sm:$0xff] %vm522_vm1, %v395_v56 }
  0xf5   : > { %v410_v57 = vpop.permute.xlu1 %409  ;;  %v405_v58 = vpop.permute.xlu0 %404 }
  0xf6   : > { %532 = vst.msk [vmem:[%s1079_s20 + $0x48] sm:$0xff] %vm522_vm1, %v410_v57  ;;  %531 = vst.msk [vmem:[%s1079_s20 + $0x40] sm:$0xff] %vm522_vm1, %v405_v58 }
  0xf9   : > { %v420_v59 = vpop.permute.xlu1 %419  ;;  %v415_v60 = vpop.permute.xlu0 %414 }
  0xfa   : > { %534 = vst.msk [vmem:[%s1079_s20 + $0x58] sm:$0xff] %vm522_vm1, %v420_v59  ;;  %533 = vst.msk [vmem:[%s1079_s20 + $0x50] sm:$0xff] %vm522_vm1, %v415_v60 }
  0xfd   : > { %v430_v61 = vpop.permute.xlu1 %429  ;;  %v425_v62 = vpop.permute.xlu0 %424 }
  0xfe   : > { %536 = vst.msk [vmem:[%s1079_s20 + $0x68] sm:$0xff] %vm522_vm1, %v430_v61  ;;  %535 = vst.msk [vmem:[%s1079_s20 + $0x60] sm:$0xff] %vm522_vm1, %v425_v62 }
 0x101   : > { %v440_v63 = vpop.permute.xlu1 %439  ;;  %v435_v0 = vpop.permute.xlu0 %434 }
 0x102   : > { %538 = vst.msk [vmem:[%s1079_s20 + $0x78] sm:$0xff] %vm522_vm1, %v440_v63  ;;  %537 = vst.msk [vmem:[%s1079_s20 + $0x70] sm:$0xff] %vm522_vm1, %v435_v0 }
 0x105   : > { %v450_v1 = vpop.permute.xlu1 %449  ;;  %v445_v2 = vpop.permute.xlu0 %444 }
 0x106   : > { %540 = vst.msk [vmem:[%s1079_s20 + $0x88] sm:$0xff] %vm522_vm1, %v450_v1  ;;  %539 = vst.msk [vmem:[%s1079_s20 + $0x80] sm:$0xff] %vm522_vm1, %v445_v2 }
 0x109   : > { %v460_v3 = vpop.permute.xlu1 %459  ;;  %v455_v4 = vpop.permute.xlu0 %454 }
 0x10a   : > { %542 = vst.msk [vmem:[%s1079_s20 + $0x98] sm:$0xff] %vm522_vm1, %v460_v3  ;;  %541 = vst.msk [vmem:[%s1079_s20 + $0x90] sm:$0xff] %vm522_vm1, %v455_v4 }
 0x10d   : > { %v470_v5 = vpop.permute.xlu1 %469  ;;  %v465_v6 = vpop.permute.xlu0 %464 }
 0x10e   : > { %544 = vst.msk [vmem:[%s1079_s20 + $0xa8] sm:$0xff] %vm522_vm1, %v470_v5  ;;  %543 = vst.msk [vmem:[%s1079_s20 + $0xa0] sm:$0xff] %vm522_vm1, %v465_v6 }
 0x111   : > { %v480_v7 = vpop.permute.xlu1 %479  ;;  %v475_v8 = vpop.permute.xlu0 %474 }
 0x112   : > { %546 = vst.msk [vmem:[%s1079_s20 + $0xb8] sm:$0xff] %vm522_vm1, %v480_v7  ;;  %545 = vst.msk [vmem:[%s1079_s20 + $0xb0] sm:$0xff] %vm522_vm1, %v475_v8 }
 0x115   : > { %v490_v9 = vpop.permute.xlu1 %489  ;;  %v485_v10 = vpop.permute.xlu0 %484 }
 0x116   : > { %548 = vst.msk [vmem:[%s1079_s20 + $0xc8] sm:$0xff] %vm522_vm1, %v490_v9  ;;  %547 = vst.msk [vmem:[%s1079_s20 + $0xc0] sm:$0xff] %vm522_vm1, %v485_v10 }
 0x119   : > { %v500_v11 = vpop.permute.xlu1 %499  ;;  %v495_v12 = vpop.permute.xlu0 %494 }
 0x11a   : > { %550 = vst.msk [vmem:[%s1079_s20 + $0xd8] sm:$0xff] %vm522_vm1, %v500_v11  ;;  %549 = vst.msk [vmem:[%s1079_s20 + $0xd0] sm:$0xff] %vm522_vm1, %v495_v12 }
 0x11d   : > { %v510_v13 = vpop.permute.xlu1 %509  ;;  %v505_v14 = vpop.permute.xlu0 %504 }
 0x11e   : > { %552 = vst.msk [vmem:[%s1079_s20 + $0xe8] sm:$0xff] %vm522_vm1, %v510_v13  ;;  %551 = vst.msk [vmem:[%s1079_s20 + $0xe0] sm:$0xff] %vm522_vm1, %v505_v14 }
 0x121   : > { %v520_v15 = vpop.permute.xlu1 %519  ;;  %v515_v16 = vpop.permute.xlu0 %514 }
 0x122   : > { %554 = vst.msk [vmem:[%s1079_s20 + $0xf8] sm:$0xff] %vm522_vm1, %v520_v15  ;;  %553 = vst.msk [vmem:[%s1079_s20 + $0xf0] sm:$0xff] %vm522_vm1, %v515_v16 }
 0x123 PF: > { %s691_s23 = sshll.u32 %s911_s12, 12  ;;  %s572_s30 = sshll.u32 %s1079_s20, 4  ;;  %s1218_s30 = int_to_ptr.vmem [resolvable:$true] %s572_s30 }
 0x124   : > { %s1215_s28 = scalar_lea.hbm %s1270_s2, %s691_s23  ;;  %s1222_s3 = scalar_lea.sflag [#allocation4], %s171_s27 }
 0x125   : > { %s833_s4 = scalar_lea.vmem %s1218_s30, 4096  ;;  %p1282_p10 = scmp.ne.s32.totalorder %s1275_s19, 0 }
 0x126   : > { %p834_p8 = scmp.ne.s32.totalorder %s1218_s30, %s833_s4  ;;  %s928_s12 = smov [#allocation7]  }
 0x127   : > { %s837_s5 = sshll.u32 %s928_s12, 4  ;;  %s838_s5 = int_to_ptr.vmem [resolvable:$false] %s837_s5 }
 0x128   : > { %p835_p11 = pnand %p834_p8, %p1282_p10  ;;  %s839_s6 = scalar_lea.vmem %s838_s5, 8192 }
 0x129   : > { %p840_p3 = scmp.lt.s32.totalorder %s1218_s30, %s838_s5  ;;  %p841_p5 = scmp.lt.s32.totalorder %s839_s6, %s833_s4 }
 0x12a   : > { %p836_p2 = pneg %p835_p11 }
 0x12b   : > { %p842_p6 = por %p841_p5, %p840_p3 }
 0x12d   : > { %p843_p7 = pnand %p842_p6, %p836_p2 }
 0x12f   : > { %846 = shalt.err (!%p843_p7)
}
 0x130   : > { %s847_s7 = scalar_lea.hbm %s1215_s28, 4096  ;;  %s851_s15 = scalar_lea.hbm %s1270_s2, 8192 }
 0x131   : > { %p848_p9 = scmp.ne.s32.totalorder %s1215_s28, %s847_s7  ;;  %p852_p1 = scmp.lt.u32.totalorder %s1215_s28, %s1270_s2 }
 0x132   : > { %p853_p13 = scmp.lt.u32.totalorder %s851_s15, %s847_s7  ;;  %p855_p8 = scmp.lt.u32.totalorder %s847_s7, %s1215_s28 }
 0x133   : > { %p849_p12 = pnand %p848_p9, %p1282_p10 }
 0x134   : > { %p854_p4 = por %p853_p13, %p852_p1 }
 0x135   : > { %p850_p0 = pneg %p849_p12 }
 0x136   : > { %p856_p11 = por %p855_p8, %p854_p4 }
 0x138   : > { %p857_p2 = pnand %p856_p11, %p850_p0 }
 0x13a   : > { %860 = shalt.err (!%p857_p2)
}
 0x13b   : > { %s929_s27 = smov 128   ;;  %s930_s29 = smov 8  }
 0x13c   : > { %700 = dma.vmem_to_hbm [thread:$0]  (%p1282_p10), %s1218_s30, 4096, %s1215_s28, %s1222_s3, %s929_s27, %s929_s27, %s930_s29  }
 0x13d PF: > { %p717_p3 = scmp.ge.s32.totalorder %s919_s14, 2  ;;  %s587_s20 = sand.u32 1, %s899_s9  }
 0x13e   : > { %p1283_p5 = scmp.ne.s32.totalorder %s1276_s21, 0  ;;  %s588_s23 = scalar_lea.sflag [#allocation4], %s587_s20 }
 0x140   : > { %p710_p6 = pnand %p717_p3, %p1283_p5 }
 0x142   : > { %894 = dma.done.wait (!%p710_p6), %s588_s23, 4096  }
 0x143   : > { %896 = vsyncadd (!%p710_p6), %s588_s23, 4294963200  ;;  %s17_s14 = sadd.s32 1, %s919_s14   ;;  %s1284_s9 = smov %s903_s10 }
 0x144   : > { %p14_p7 = scmp.ge.s32.totalorder %s17_s14, 4   ;;  %s1285_s10 = smov %s907_s11 }
 0x145   : > { %s1286_s11 = smov %s999_s22  ;;  %s1287_s12 = smov %s915_s13 }
 0x146   : > { %s1288_s13 = smov %s1290_s17  ;;  %16 = sbr.rel (!%p14_p7) target bundleno = 6 (0x6), region = 78 }
 0x14d   :  { %593 = vsyncpa [#allocation3], 1 }
 0x14e   :  { %595 = vsyncpa [#allocation3 + $0x1], 1 }
 0x14f   :  { %596 = vsyncpa [#allocation6], 1 }
 0x150   :  { %597 = vsyncpa [#allocation4], 1 }
 0x151   :  { %599 = vsyncpa [#allocation4 + $0x1], 1 }

</bundles_post_ra>
